<compile_context>
chip_gen: v5e
topology: v5e:2x2
jax: 0.10.0
libtpu: 0.0.40
codegen_flags: <defaults>
</compile_context>

<pallas_src>
import jax
import jax.numpy as jnp
from jax.experimental import pallas as pl
from jax.experimental.pallas import tpu as pltpu


# --------------------------------- kernel ------------------------------------

def _patch_embed_kernel(x_ref, w_ref, b_ref, o_ref):
    # x_ref: (tm, Kp) patch rows; w_ref: (Kp, tn) resident weight; b_ref: (1, tn) f32.
    acc = jnp.dot(x_ref[...], w_ref[...], preferred_element_type=jnp.float32)
    o_ref[...] = (acc + b_ref[...]).astype(o_ref.dtype)


# --------------------------------- wrapper ------------------------------------

def _round_up(a, m):
    return ((a + m - 1) // m) * m


def patch_embed_pallas(x, weight, bias, patch_size, *, tm=512, tn=None,
                       compute_dtype=jnp.bfloat16, out_dtype=jnp.float32):
    """x: (B, C, H, W); weight: (E, C, p, p); bias: (E,). Returns (B, N, E)."""
    B, C, H, W = x.shape
    p = patch_size
    assert H % p == 0 and W % p == 0, "image size must be divisible by patch size"
    Hp, Wp = H // p, W // p
    num_patches = Hp * Wp
    E = weight.shape[0]
    K = C * p * p
    M = B * num_patches

    # Cast BEFORE the (full HBM read+write) im2col transpose so the layout
    # pass moves compute_dtype bytes, not f32 bytes.
    if x.dtype != compute_dtype:
        x = x.astype(compute_dtype)

    # ---- im2col in the wrapper (layout plumbing only, no compute) ----
    # (B, C, Hp, p, Wp, p) -> (B, Hp, Wp, C, p, p) -> (B*num_patches, C*p*p)
    patches = x.reshape(B, C, Hp, p, Wp, p)
    patches = patches.transpose(0, 2, 4, 1, 3, 5).reshape(M, K)

    # Conv weight (E, C, p, p) -> GEMM weight (K, E); bias -> (1, E) f32.
    w2d = weight.reshape(E, K).T.astype(compute_dtype)
    b2d = bias.reshape(1, E).astype(jnp.float32)

    # Lane-align the contraction dim (zero padding is exact, full MXU passes).
    Kp = _round_up(K, 128)
    if Kp != K:
        patches = jnp.pad(patches, ((0, 0), (0, Kp - K)))
        w2d = jnp.pad(w2d, ((0, Kp - K), (0, 0)))

    # Lane-align the embed dim so output stores are full-width (no vst.msk).
    Np = _round_up(E, 128)
    if Np != E:
        w2d = jnp.pad(w2d, ((0, 0), (0, Np - E)))
        b2d = jnp.pad(b2d, ((0, 0), (0, Np - E)))

    # N tile: default = whole (padded) embed dim -> weight resident in VMEM,
    # DMA'd exactly once per N tile (once total when n_tiles == 1).
    if tn is None:
        tn = Np
    tn = min(_round_up(tn, 128), Np)
    if Np % tn != 0:
        new_np = _round_up(Np, tn)
        w2d = jnp.pad(w2d, ((0, 0), (0, new_np - Np)))
        b2d = jnp.pad(b2d, ((0, 0), (0, new_np - Np)))
        Np = new_np

    # M tile: multiple of the sublane packing (16 for bf16, 8 for f32).
    pack = 16 if jnp.dtype(compute_dtype).itemsize == 2 else 8
    tm = max(pack, min(tm, _round_up(M, pack)))
    tm = _round_up(tm, pack)

    n_tiles = Np // tn
    m_tiles = pl.cdiv(M, tm)  # masked tail block: no jnp.pad copy of patches

    in_item = jnp.dtype(compute_dtype).itemsize
    cost = pl.CostEstimate(
        flops=2 * M * Kp * Np,
        transcendentals=0,
        bytes_accessed=(M * Kp * in_item + Kp * Np * in_item + Np * 4
                        + M * Np * jnp.dtype(out_dtype).itemsize),
    )

    out = pl.pallas_call(
        _patch_embed_kernel,
        # N outermost: weight/bias block index changes only n_tiles times;
        # with the default n_tiles == 1 they are fetched once and stay resident.
        grid=(n_tiles, m_tiles),
        in_specs=[
            pl.BlockSpec((tm, Kp), lambda j, i: (i, 0)),   # patch rows (streamed)
            pl.BlockSpec((Kp, tn), lambda j, i: (0, j)),   # weight (resident)
            pl.BlockSpec((1, tn), lambda j, i: (0, j)),    # bias (resident)
        ],
        out_specs=pl.BlockSpec((tm, tn), lambda j, i: (i, j)),
        out_shape=jax.ShapeDtypeStruct((M, Np), out_dtype),
        compiler_params=pltpu.CompilerParams(
            dimension_semantics=("parallel", "parallel")),
        cost_estimate=cost,
    )(patches, w2d, b2d)

    return out[:, :E].reshape(B, num_patches, E)


# --------------------------- pure-JAX reference -------------------------------

def patch_embed_ref(x, weight, bias, patch_size):
    p = patch_size
    out = jax.lax.conv_general_dilated(
        x, weight, window_strides=(p, p), padding="VALID",
        dimension_numbers=("NCHW", "OIHW", "NCHW"))
    B, E, Hp, Wp = out.shape
    out = out + bias.reshape(1, E, 1, 1)
    return out.reshape(B, E, Hp * Wp).transpose(0, 2, 1)   # (B, N, E)


# ----------------------------------- main -------------------------------------

if __name__ == "__main__":
    # Small PatchEmbed config: img 64x64, patch 8, in_chans 3, embed_dim 256.
    B, C_in, H, W = 2, 3, 64, 64
    p = 8
    E = 256
    num_patches = (H // p) * (W // p)   # 64

    key = jax.random.PRNGKey(0)
    kx, kw, kb = jax.random.split(key, 3)
    x = jax.random.normal(kx, (B, C_in, H, W), jnp.float32)
    weight = (0.02 * jax.random.normal(kw, (E, C_in, p, p))).astype(jnp.float32)
    bias = (0.02 * jax.random.normal(kb, (E,))).astype(jnp.float32)

    # tm=64 so the demo exercises a multi-tile (parallel) M grid.
    out_bf16 = patch_embed_pallas(x, weight, bias, p, tm=64)                      # default bf16 path
    out_f32 = patch_embed_pallas(x, weight, bias, p, tm=64,
                                 compute_dtype=jnp.float32)                       # exact path
    jax.block_until_ready((out_bf16, out_f32))

    ref = patch_embed_ref(x, weight, bias, p)
    assert out_bf16.shape == (B, num_patches, E), out_bf16.shape
    assert out_f32.shape == (B, num_patches, E), out_f32.shape

    diff_f32 = float(jnp.max(jnp.abs(out_f32 - ref)))
    assert bool(jnp.allclose(out_f32, ref, atol=1e-4, rtol=1e-4)), (
        "f32 path mismatch vs reference: max abs diff = " + str(diff_f32))

    diff_bf16 = float(jnp.max(jnp.abs(out_bf16 - ref)))
    assert bool(jnp.allclose(out_bf16, ref, atol=2e-2, rtol=2e-2)), (
        "bf16 path mismatch vs reference: max abs diff = " + str(diff_bf16))

    print("KERNEL_OK")
</pallas_src>

<mosaic_0001>
module attributes {stable_mosaic.version = 11 : i64} {
  func.func @_patch_embed_kernel(%arg0: i32, %arg1: i32, %arg2: memref<64x256xbf16, #tpu.memory_space<vmem>>, %arg3: memref<256x256xbf16, #tpu.memory_space<vmem>>, %arg4: memref<1x256xf32, #tpu.memory_space<vmem>>, %arg5: memref<64x256xf32, #tpu.memory_space<vmem>>) attributes {dimension_semantics = [#tpu.dimension_semantics<parallel>, #tpu.dimension_semantics<parallel>], iteration_bounds = array<i64: 1, 2>, scalar_prefetch = 0 : i64, scratch_operands = 0 : i64, tpu.core_type = #tpu.core_type<tc>, window_params = [{transform_indices = @transform_0, window_bounds = array<i64: 64, 256>}, {transform_indices = @transform_1, window_bounds = array<i64: 256, 256>}, {transform_indices = @transform_2, window_bounds = array<i64: 1, 256>}, {transform_indices = @transform_3, window_bounds = array<i64: 64, 256>}]} {
    %c0 = arith.constant 0 : index
    %c0_0 = arith.constant 0 : index
    %0 = vector.load %arg2[%c0, %c0_0] : memref<64x256xbf16, #tpu.memory_space<vmem>>, vector<64x256xbf16>
    %c0_1 = arith.constant 0 : index
    %c0_2 = arith.constant 0 : index
    %1 = vector.load %arg3[%c0_1, %c0_2] : memref<256x256xbf16, #tpu.memory_space<vmem>>, vector<256x256xbf16>
    %cst = arith.constant dense<0.000000e+00> : vector<64x256xf32>
    %2 = tpu.matmul %0, %1, %cst {dimension_numbers = #tpu.dot_dimension_numbers<[1], [0], [0], [1], [0, 0, 1, 1], [], []>} : vector<64x256xbf16>, vector<256x256xbf16>, vector<64x256xf32> -> vector<64x256xf32>
    %c0_3 = arith.constant 0 : index
    %c0_4 = arith.constant 0 : index
    %3 = vector.load %arg4[%c0_3, %c0_4] : memref<1x256xf32, #tpu.memory_space<vmem>>, vector<1x256xf32>
    %4 = vector.broadcast %3 : vector<1x256xf32> to vector<64x256xf32>
    %5 = arith.addf %2, %4 : vector<64x256xf32>
    %c0_5 = arith.constant 0 : index
    %c0_6 = arith.constant 0 : index
    %6 = vector.load %arg5[%c0_5, %c0_6] : memref<64x256xf32, #tpu.memory_space<vmem>>, vector<64x256xf32>
    tpu.vector_store %arg5[%c0_5, %c0_6], %5 {strides = array<i32>} : memref<64x256xf32, #tpu.memory_space<vmem>>, vector<64x256xf32>,
    return
  }
  func.func @transform_0(%arg0: i32, %arg1: i32) -> (i32, i32) {
    %c0_i32 = arith.constant 0 : i32
    %c0_i32_0 = arith.constant 0 : i32
    return %arg1, %c0_i32 : i32, i32
  }
  func.func @transform_1(%arg0: i32, %arg1: i32) -> (i32, i32) {
    %c0_i32 = arith.constant 0 : i32
    %c0_i32_0 = arith.constant 0 : i32
    return %c0_i32, %arg0 : i32, i32
  }
  func.func @transform_2(%arg0: i32, %arg1: i32) -> (i32, i32) {
    %c0_i32 = arith.constant 0 : i32
    %c0_i32_0 = arith.constant 0 : i32
    return %c0_i32, %arg0 : i32, i32
  }
  func.func @transform_3(%arg0: i32, %arg1: i32) -> (i32, i32) {
    %c0_i32 = arith.constant 0 : i32
    return %arg1, %arg0 : i32, i32
  }
}

</mosaic_0001>

<bundles_post_ra>
// kernel: tpu_custom_call.1
= control target key start
LH: loop header
LB: loop body
LE: loop exit
PB: predicated region body
PF: predicated region fallthrough
CT: control target
= control target key end

     0   :  { %8 = vsyncpa [#allocation3], 0  ;;  %s1483_s0 = inlined_call_operand.hbm [shape: bf16[128,256], index: 0, kind: input, shape index: {}]   ;;  %s1484_s1 = inlined_call_operand.hbm [shape: bf16[256,256], index: 1, kind: input, shape index: {}]   ;;  %s1485_s2 = inlined_call_operand.hbm [shape: f32[1,256], index: 2, kind: input, shape index: {}]   ;;  %s1486_s3 = inlined_call_operand.hbm [shape: f32[128,256], index: 3, kind: output, shape index: {}]  }
   0x1   :  { %10 = vsyncpa [#allocation3 + $0x1], 0 }
   0x2   :  { %11 = vsyncpa [#allocation6], 0 }
   0x3   :  { %12 = vsyncpa [#allocation4], 0 }
   0x4   :  { %14 = vsyncpa [#allocation4 + $0x1], 0  ;;  %s1277_s12 = smov 0   ;;  %s1279_s13 = smov 0  }
   0x5   :  { %s1281_s14 = smov 0   ;;  %s1283_s15 = smov 0  }
   0x6   :  { %s1285_s16 = smov 0   ;;  %s1287_s17 = smov 0  }
   0x7 LB: > { %s761_s18 = sadd.s32 4294967295, %s1249_s17   ;;  %s762_s19 = sadd.s32 4294967294, %s1249_s17   ;;  %s1249_s17 = sphi %s1287_s17, %s20_s17   ;;  %s1245_s16 = sphi %s1285_s16, %s1496_s16   ;;  %s1241_s15 = sphi %s1283_s15, %s1495_s15   ;;  %s1237_s14 = sphi %s1281_s14, %s1494_s14   ;;  %s1233_s13 = sphi %s1279_s13, %s1493_s13   ;;  %s1229_s12 = sphi %s1277_s12, %s1492_s12  }
   0x8   : > { %p52_p0 = scmp.ne.s32.totalorder %s1233_s13, %s1229_s12  ;;  %p1311_p1 = scmp.eq.s32.totalorder %s761_s18, 0 }
   0x9   : > { %p136_p2 = scmp.eq.s32.totalorder %s762_s19, 1  ;;  %p763_p4 = scmp.ge.s32.totalorder %s1249_s17, 1 }
   0xa   : > { %p1317_p3 = por %p1311_p1, %p52_p0  ;;  %p143_p6 = scmp.lt.s32.totalorder %s1249_s17, 3 }
   0xb   : > { %p1322_p5 = por %p136_p2, %p52_p0  ;;  %s157_s25 = sshll.u32 %s1484_s1, 4  ;;  %s158_s25 = int_to_ptr.hbm [resolvable:$true] %s157_s25 }
   0xc   : > { %p1330_p7 = pnand %p763_p4, %p143_p6  ;;  %s1251_s27 = smov [#allocation5]  }
   0xd   : > { %s159_s28 = sshll.u32 %s1251_s27, 4  ;;  %p766_p10 = scmp.ge.s32.totalorder %s1249_s17, 2  ;;  %s160_s28 = int_to_ptr.vmem [resolvable:$true] %s159_s28 }
   0xe   : > { %p998_p8 = pneg %p1330_p7  ;;  %s174_s4 = sshll.u32 %s1485_s2, 4  ;;  %s175_s4 = int_to_ptr.hbm [resolvable:$true] %s174_s4 }
   0xf   : > { %s1252_s5 = smov 128   ;;  %s1253_s6 = smov 8  }
  0x10   : > { %p999_p9 = pnand %p998_p8, %p1311_p1  ;;  %s1254_s7 = smov [#allocation7]  }
  0x11   : > { %s176_s8 = sshll.u32 %s1254_s7, 4  ;;  %p130_p11 = scmp.eq.s32.totalorder %s761_s18, 1  ;;  %s177_s8 = int_to_ptr.vmem [resolvable:$true] %s176_s8 }
  0x12   : > { %1001 = dma.hbm_to_vmem [thread:$0]  (!%p999_p9), %s158_s25, 4096, %s160_s28, [#allocation6], %s1252_s5, %s1252_s5, %s1253_s6  }
  0x13   : > { %1004 = dma.hbm_to_vmem [thread:$0]  (!%p999_p9), %s175_s4, 32, %s177_s8, [#allocation6]  }
  0x14   : > { %s29_s9 = sadd.s32 1, %s1245_s16  ;;  %s39_s10 = sadd.s32 1, %s1237_s14 }
  0x15   : > { %p30_p12 = scmp.ge.s32.totalorder %s29_s9, 2  ;;  %p46_p13 = scmp.ne.s32.totalorder %s1237_s14, %s1233_s13 }
  0x16   : > { %p47_p0 = scmp.eq.s32.totalorder %s1249_s17, 0  ;;  %p1015_p4 = scmp.lt.s32.totalorder %s1249_s17, 2 }
  0x17   : > { %s1498_s9 = smov (%p30_p12, %s29_s9), 0  ;;  %p1352_p2 = por %p130_p11, %p46_p13 }
  0x18   : > { %s36_s19 = ssub.s32 %s1245_s16, %s1498_s9  ;;  %s187_s23 = sand.u32 1, %s1237_s14  }
  0x19   : > { %p37_p6 = scmp.eq.s32.totalorder %s36_s19, 0  ;;  %p48_p8 = por %p47_p0, %p46_p13 }
  0x1a   : > { %s767_s24 = sshll.u32 %s187_s23, 6  ;;  %s943_s18 = sshll.u32 %s1245_s16, 6 }
  0x1b   : > { %s1362_s25 = scalar_select %p37_p6, %s1237_s14, %s39_s10  }
  0x1c   : > { %s197_s29 = scalar_lea.hbm %s1483_s0, %s943_s18  ;;  %s191_s4 = scalar_lea.vmem [#allocation2], %s767_s24 }
  0x1d   : > { %s198_s30 = sshll.u32 %s197_s29, 4  ;;  %s200_s7 = sshll.u32 %s191_s4, 4  ;;  %s199_s30 = int_to_ptr.hbm [resolvable:$true] %s198_s30  ;;  %s201_s7 = int_to_ptr.vmem [resolvable:$true] %s200_s7 }
  0x1e   : > { %p1006_p9 = pnand %p1015_p4, %p48_p8  ;;  %s188_s8 = scalar_lea.sflag [#allocation3], %s187_s23 }
  0x1f   : > { %212 = sbr.rel (%p1330_p7) target bundleno = 271 (0x10f), region = 32  ;;  %s1375_s10 = sand.u32 (!%p1330_p7), 1, %s1233_s13  }
  0x20   : > { %1008 = dma.hbm_to_vmem [thread:$0]  (!%p1006_p9), %s199_s30, 1024, %s201_s7, %s188_s8, %s1252_s5, %s1252_s5, %s1253_s6  }
  0x21   : > { %s772_s19 = sshll.u32 (!%p1330_p7), %s1375_s10, 6  ;;  %s215_s24 = scalar_lea.sflag (!%p1330_p7), [#allocation3], %s1375_s10 }
  0x22   : > { %s1379_s18 = scalar_lea.vmem (!%p1330_p7), [#allocation2], %s772_s19 }
  0x24   : > { %1216 = dma.done.wait (%p1317_p3), %s215_s24, 1024  }
  0x25   : > { %1218 = vsyncadd (%p1317_p3), %s215_s24, 4294966272 }
  0x26   : > { %1220 = dma.done.wait (%p1311_p1), [#allocation6], 4128  }
  0x27   : > { %1222 = vsyncadd (%p1311_p1), [#allocation6], 4294963168  ;;  %v866_v0 = vld [vmem:[#allocation5 + $0x70] sm:$0xf]  ;;  %v967_v1 = vld [vmem:[#allocation5 + $0x74] sm:$0xf0] }
  0x28   : > { %v930_v2 = vld [vmem:[#allocation5 + $0xf0] sm:$0xf]  ;;  %v867_v3 = vor.u32 %v967_v1, %v866_v0  ;;  %v983_v4 = vld [vmem:[#allocation5 + $0xf4] sm:$0xf0]  ;;  %v966_v5 = vld [vmem:[#allocation5 + $0x74] sm:$0xf] }
  0x29   : > { %v868_v6 = vld [vmem:[#allocation5 + $0x78] sm:$0xf0]  ;;  %v931_v7 = vor.u32 %v983_v4, %v930_v2  ;;  %v982_v9 = vld [vmem:[#allocation5 + $0xf4] sm:$0xf]  ;;  %v858_v11 = vld [vmem:[#allocation5 + $0x60] sm:$0xf] }
  0x2a   : > { %v871_v8 = vor.u32 %v966_v5, %v868_v6  ;;  %v932_v10 = vld [vmem:[#allocation5 + $0xf8] sm:$0xf0]  ;;  %503 = vmatpush.bf16.msra.mxu0 %v867_v3  ;;  %v965_v13 = vld [vmem:[#allocation5 + $0x64] sm:$0xf0]  ;;  %v922_v14 = vld [vmem:[#allocation5 + $0xe0] sm:$0xf] }
  0x2b   : > { %v935_v12 = vor.u32 %v982_v9, %v932_v10  ;;  %v981_v15 = vld [vmem:[#allocation5 + $0xe4] sm:$0xf0]  ;;  %532 = vmatpush.bf16.msra.mxu1 %v931_v7  ;;  %v859_v16 = vor.u32 %v965_v13, %v858_v11  ;;  %v964_v18 = vld [vmem:[#allocation5 + $0x64] sm:$0xf]  ;;  %v860_v19 = vld [vmem:[#allocation5 + $0x68] sm:$0xf0] }
  0x2c   : > { %561 = vmatpush.bf16.msra.mxu2 %v871_v8  ;;  %v923_v17 = vor.u32 %v981_v15, %v922_v14  ;;  %v980_v20 = vld [vmem:[#allocation5 + $0xe4] sm:$0xf]  ;;  %v863_v21 = vor.u32 %v964_v18, %v860_v19  ;;  %v924_v22 = vld [vmem:[#allocation5 + $0xe8] sm:$0xf0]  ;;  %v850_v23 = vld [vmem:[#allocation5 + $0x50] sm:$0xf] }
  0x2d   : > { %590 = vmatpush.bf16.msra.mxu3 %v935_v12  ;;  %v963_v24 = vld [vmem:[#allocation5 + $0x54] sm:$0xf0]  ;;  %v927_v25 = vor.u32 %v980_v20, %v924_v22  ;;  %v914_v26 = vld [vmem:[#allocation5 + $0xd0] sm:$0xf]  ;;  %v962_v28 = vld [vmem:[#allocation5 + $0x54] sm:$0xf] }
  0x2e   : > { %v979_v27 = vld [vmem:[#allocation5 + $0xd4] sm:$0xf0]  ;;  %504 = vmatpush.bf16.msra.mxu0 %v859_v16  ;;  %v851_v29 = vor.u32 %v963_v24, %v850_v23  ;;  %v852_v30 = vld [vmem:[#allocation5 + $0x58] sm:$0xf0]  ;;  %v978_v31 = vld [vmem:[#allocation5 + $0xd4] sm:$0xf] }
  0x2f   : > { %v916_v32 = vld [vmem:[#allocation5 + $0xd8] sm:$0xf0]  ;;  %533 = vmatpush.bf16.msra.mxu1 %v923_v17  ;;  %v915_v33 = vor.u32 %v979_v27, %v914_v26  ;;  %v855_v34 = vor.u32 %v962_v28, %v852_v30  ;;  %v842_v35 = vld [vmem:[#allocation5 + $0x40] sm:$0xf]  ;;  %v961_v36 = vld [vmem:[#allocation5 + $0x44] sm:$0xf0] }
  0x30   : > { %562 = vmatpush.bf16.msra.mxu2 %v863_v21  ;;  %v906_v37 = vld [vmem:[#allocation5 + $0xc0] sm:$0xf]  ;;  %v919_v38 = vor.u32 %v978_v31, %v916_v32  ;;  %v977_v39 = vld [vmem:[#allocation5 + $0xc4] sm:$0xf0]  ;;  %v960_v40 = vld [vmem:[#allocation5 + $0x44] sm:$0xf]  ;;  %v843_v44 = vor.u32 %v961_v36, %v842_v35 }
  0x31   : > { %591 = vmatpush.bf16.msra.mxu3 %v927_v25  ;;  %v844_v41 = vld [vmem:[#allocation5 + $0x48] sm:$0xf0]  ;;  %v976_v42 = vld [vmem:[#allocation5 + $0xc4] sm:$0xf]  ;;  %v907_v45 = vor.u32 %v977_v39, %v906_v37  ;;  %v834_v47 = vld [vmem:[#allocation5 + $0x30] sm:$0xf] }
  0x32   : > { %v908_v43 = vld [vmem:[#allocation5 + $0xc8] sm:$0xf0]  ;;  %505 = vmatpush.bf16.msra.mxu0 %v851_v29  ;;  %v847_v46 = vor.u32 %v960_v40, %v844_v41  ;;  %v959_v48 = vld [vmem:[#allocation5 + $0x34] sm:$0xf0]  ;;  %v898_v49 = vld [vmem:[#allocation5 + $0xb0] sm:$0xf] }
  0x33   : > { %534 = vmatpush.bf16.msra.mxu1 %v915_v33  ;;  %v911_v50 = vor.u32 %v976_v42, %v908_v43  ;;  %v975_v51 = vld [vmem:[#allocation5 + $0xb4] sm:$0xf0]  ;;  %v958_v52 = vld [vmem:[#allocation5 + $0x34] sm:$0xf]  ;;  %v836_v53 = vld [vmem:[#allocation5 + $0x38] sm:$0xf0]  ;;  %v835_v56 = vor.u32 %v959_v48, %v834_v47 }
  0x34   : > { %563 = vmatpush.bf16.msra.mxu2 %v855_v34  ;;  %v974_v54 = vld [vmem:[#allocation5 + $0xb4] sm:$0xf]  ;;  %v900_v55 = vld [vmem:[#allocation5 + $0xb8] sm:$0xf0]  ;;  %v899_v57 = vor.u32 %v975_v51, %v898_v49  ;;  %v839_v58 = vor.u32 %v958_v52, %v836_v53  ;;  %v826_v59 = vld [vmem:[#allocation5 + $0x20] sm:$0xf] }
  0x35   : > { %592 = vmatpush.bf16.msra.mxu3 %v919_v38  ;;  %v957_v60 = vld [vmem:[#allocation5 + $0x24] sm:$0xf0]  ;;  %v890_v61 = vld [vmem:[#allocation5 + $0xa0] sm:$0xf]  ;;  %v903_v62 = vor.u32 %v974_v54, %v900_v55  ;;  %v956_v0 = vld [vmem:[#allocation5 + $0x24] sm:$0xf] }
  0x36   : > { %506 = vmatpush.bf16.msra.mxu0 %v843_v44  ;;  %v973_v63 = vld [vmem:[#allocation5 + $0xa4] sm:$0xf0]  ;;  %v828_v1 = vld [vmem:[#allocation5 + $0x28] sm:$0xf0]  ;;  %v972_v2 = vld [vmem:[#allocation5 + $0xa4] sm:$0xf]  ;;  %v827_v4 = vor.u32 %v957_v60, %v826_v59 }
  0x37   : > { %535 = vmatpush.bf16.msra.mxu1 %v907_v45  ;;  %v892_v3 = vld [vmem:[#allocation5 + $0xa8] sm:$0xf0]  ;;  %v891_v5 = vor.u32 %v973_v63, %v890_v61  ;;  %v831_v6 = vor.u32 %v956_v0, %v828_v1  ;;  %v818_v7 = vld [vmem:[#allocation5 + $0x10] sm:$0xf]  ;;  %v955_v8 = vld [vmem:[#allocation5 + $0x14] sm:$0xf0] }
  0x38   : > { %564 = vmatpush.bf16.msra.mxu2 %v847_v46  ;;  %v882_v9 = vld [vmem:[#allocation5 + $0x90] sm:$0xf]  ;;  %v895_v10 = vor.u32 %v972_v2, %v892_v3  ;;  %v971_v11 = vld [vmem:[#allocation5 + $0x94] sm:$0xf0]  ;;  %v954_v12 = vld [vmem:[#allocation5 + $0x14] sm:$0xf]  ;;  %v819_v16 = vor.u32 %v955_v8, %v818_v7 }
  0x39   : > { %593 = vmatpush.bf16.msra.mxu3 %v911_v50  ;;  %v820_v13 = vld [vmem:[#allocation5 + $0x18] sm:$0xf0]  ;;  %v970_v14 = vld [vmem:[#allocation5 + $0x94] sm:$0xf]  ;;  %v883_v17 = vor.u32 %v971_v11, %v882_v9  ;;  %v810_v19 = vld [vmem:[#allocation5] sm:$0xf] }
  0x3a   : > { %507 = vmatpush.bf16.msra.mxu0 %v835_v56  ;;  %v884_v15 = vld [vmem:[#allocation5 + $0x98] sm:$0xf0]  ;;  %v823_v18 = vor.u32 %v954_v12, %v820_v13  ;;  %v953_v20 = vld [vmem:[#allocation5 + $0x4] sm:$0xf0]  ;;  %v874_v21 = vld [vmem:[#allocation5 + $0x80] sm:$0xf] }
  0x3b   : > { %536 = vmatpush.bf16.msra.mxu1 %v899_v57  ;;  %v887_v22 = vor.u32 %v970_v14, %v884_v15  ;;  %v969_v23 = vld [vmem:[#allocation5 + $0x84] sm:$0xf0]  ;;  %v952_v24 = vld [vmem:[#allocation5 + $0x4] sm:$0xf]  ;;  %v812_v25 = vld [vmem:[#allocation5 + $0x8] sm:$0xf0]  ;;  %v811_v28 = vor.u32 %v953_v20, %v810_v19 }
  0x3c   : > { %565 = vmatpush.bf16.msra.mxu2 %v839_v58  ;;  %v968_v26 = vld [vmem:[#allocation5 + $0x84] sm:$0xf]  ;;  %v876_v27 = vld [vmem:[#allocation5 + $0x88] sm:$0xf0]  ;;  %v778_v29 = vld [vmem:[%s1379_s18] sm:$0xf]  ;;  %v875_v31 = vor.u32 %v969_v23, %v874_v21  ;;  %v815_v32 = vor.u32 %v952_v24, %v812_v25 }
  0x3d   : > { %594 = vmatpush.bf16.msra.mxu3 %v903_v62  ;;  %v945_v30 = vld [vmem:[%s1379_s18 + $0x4] sm:$0xf0]  ;;  %v944_v33 = vld [vmem:[%s1379_s18 + $0x4] sm:$0xf]  ;;  %v780_v34 = vld [vmem:[%s1379_s18 + $0x8] sm:$0xf0]  ;;  %v879_v35 = vor.u32 %v968_v26, %v876_v27 }
  0x3e   : > { %508 = vmatpush.bf16.msra.mxu0 %v827_v4  ;;  %v779_v36 = vor.u32 %v945_v30, %v778_v29  ;;  %v783_v37 = vor.u32 %v944_v33, %v780_v34  ;;  %v786_v38 = vld [vmem:[%s1379_s18 + $0x10] sm:$0xf]  ;;  %v947_v39 = vld [vmem:[%s1379_s18 + $0x14] sm:$0xf0]  ;;  %v946_v40 = vld [vmem:[%s1379_s18 + $0x14] sm:$0xf] }
  0x3f   : > { %537 = vmatpush.bf16.msra.mxu1 %v891_v5  ;;  %v788_v41 = vld [vmem:[%s1379_s18 + $0x18] sm:$0xf0]  ;;  %v787_v42 = vor.u32 %v947_v39, %v786_v38  ;;  %v794_v44 = vld [vmem:[%s1379_s18 + $0x20] sm:$0xf]  ;;  %v949_v45 = vld [vmem:[%s1379_s18 + $0x24] sm:$0xf0] }
  0x40   : > { %566 = vmatpush.bf16.msra.mxu2 %v831_v6  ;;  %v791_v43 = vor.u32 %v946_v40, %v788_v41  ;;  %v948_v46 = vld [vmem:[%s1379_s18 + $0x24] sm:$0xf]  ;;  %v796_v47 = vld [vmem:[%s1379_s18 + $0x28] sm:$0xf0]  ;;  %v795_v48 = vor.u32 %v949_v45, %v794_v44  ;;  %v802_v50 = vld [vmem:[%s1379_s18 + $0x30] sm:$0xf] }
  0x41   : > { %595 = vmatpush.bf16.msra.mxu3 %v895_v10  ;;  %v799_v49 = vor.u32 %v948_v46, %v796_v47  ;;  %v951_v51 = vld [vmem:[%s1379_s18 + $0x34] sm:$0xf0]  ;;  %v950_v52 = vld [vmem:[%s1379_s18 + $0x34] sm:$0xf]  ;;  %v804_v53 = vld [vmem:[%s1379_s18 + $0x38] sm:$0xf0] }
  0x42   : > { %509 = vmatpush.bf16.msra.mxu0 %v819_v16  ;;  %v803_v54 = vor.u32 %v951_v51, %v802_v50  ;;  %v807_v55 = vor.u32 %v950_v52, %v804_v53  ;;  %v297_v56 = vld [vmem:[#allocation7] sm:$0x3]  ;;  %s775_s20 = sshll.u32 %s1375_s10, 7  ;;  %s985_s26 = sshll.u32 %s1241_s15, 7 }
  0x43   : > { %538 = vmatpush.bf16.msra.mxu1 %v883_v17  ;;  %v1405_v57 = vperm.slane %v297_v56, 0  ;;  %v1409_v62 = vperm.slane %v297_v56, 1  ;;  %s1411_s21 = scalar_lea.vmem [#allocation8], %s775_s20  ;;  %s650_s23 = scalar_lea.hbm %s1486_s3, %s985_s26 }
  0x44   : > { %567 = vmatpush.bf16.msra.mxu2 %v823_v18  ;;  %s651_s27 = sshll.u32 %s1411_s21, 4  ;;  %s653_s28 = sshll.u32 %s650_s23, 4  ;;  %s652_s27 = int_to_ptr.vmem [resolvable:$true] %s651_s27  ;;  %s654_s28 = int_to_ptr.hbm [resolvable:$true] %s653_s28 }
  0x45   : > { %596 = vmatpush.bf16.msra.mxu3 %v887_v22  ;;  %s636_s15 = scalar_lea.sflag [#allocation4], %s1375_s10  ;;  %s1177_s29 = sshra.s32 %s654_s28, 4  ;;  %s1178_s29 = int_to_ptr.hbm [resolvable:$true] %s1177_s29 }
  0x46   : > { %510 = vmatpush.bf16.msra.mxu0 %v811_v28  ;;  %s1179_s30 = scalar_lea.hbm %s1178_s29, 128  ;;  %s1183_s8 = scalar_lea.hbm %s1486_s3, 256 }
  0x47   : > { %539 = vmatpush.bf16.msra.mxu1 %v875_v31  ;;  %p1180_p1 = scmp.ne.s32.totalorder %s1178_s29, %s1179_s30  ;;  %p1184_p11 = scmp.lt.s32.totalorder %s1178_s29, %s1486_s3 }
  0x48   : > { %568 = vmatpush.bf16.msra.mxu2 %v815_v32  ;;  %p1185_p12 = scmp.lt.s32.totalorder %s1183_s8, %s1179_s30 }
  0x49   : > { %597 = vmatpush.bf16.msra.mxu3 %v879_v35  ;;  %511 = vmatmul.bf16.vlgmr.msra.gmra.mxu0 %v779_v36  ;;  %p1181_p3 = pnand %p1180_p1, %p1352_p2 }
  0x4a   : > { %540 = vmatmul.bf16.vlgmr.msra.gmra.mxu1 %v783_v37  ;;  %p1186_p13 = por %p1185_p12, %p1184_p11 }
  0x4b   : > { %569 = vmatmul.bf16.vlgmr.msra.gmra.mxu2 %v779_v36  ;;  %p1182_p7 = pneg %p1181_p3 }
  0x4c   : > { %598 = vmatmul.bf16.vlgmr.msra.gmra.mxu3 %v783_v37 }
  0x4d   : > { %p1187_p0 = pnand %p1186_p13, %p1182_p7 }
  0x59   : > { %516 = vmatmul.bf16.gmra.mxu0 %v787_v42 }
  0x5a   : > { %545 = vmatmul.bf16.gmra.mxu1 %v791_v43 }
  0x5b   : > { %574 = vmatmul.bf16.gmra.mxu2 %v787_v42 }
  0x5c   : > { %603 = vmatmul.bf16.gmra.mxu3 %v791_v43 }
  0x69   : > { %521 = vmatmul.bf16.gmra.mxu0 %v795_v48 }
  0x6a   : > { %550 = vmatmul.bf16.gmra.mxu1 %v799_v49 }
  0x6b   : > { %579 = vmatmul.bf16.gmra.mxu2 %v795_v48 }
  0x6c   : > { %608 = vmatmul.bf16.gmra.mxu3 %v799_v49 }
  0x79   : > { %526 = vmatmul.bf16.gmra.mxu0 %v803_v54 }
  0x7a   : > { %555 = vmatmul.bf16.gmra.mxu1 %v807_v55 }
  0x7b   : > { %584 = vmatmul.bf16.gmra.mxu2 %v803_v54 }
  0x7c   : > { %613 = vmatmul.bf16.gmra.mxu3 %v807_v55 }
  0xc6   : > { %v512_v58 = vpop.f32.mrf.mxu0 }
  0xc7   : > { %v513_v59 = vadd.f32 %v512_v58, %v1405_v57  ;;  %v541_v60 = vpop.f32.mrf.mxu1 }
  0xc9   : > { %v542_v61 = vadd.f32 %v541_v60, %v513_v59 }
  0xcb   : > { %619 = vst [vmem:[%s1411_s21] sm:$0xff] %v542_v61 }
  0xce   : > { %v570_v63 = vpop.f32.mrf.mxu2  ;;  %v514_v2 = vpop.f32.mrf.mxu0 }
  0xcf   : > { %v571_v0 = vadd.f32 %v570_v63, %v1409_v62  ;;  %v599_v1 = vpop.f32.mrf.mxu3  ;;  %v515_v3 = vadd.f32 %v514_v2, %v1405_v57  ;;  %v543_v4 = vpop.f32.mrf.mxu1 }
  0xd1   : > { %v600_v5 = vadd.f32 %v599_v1, %v571_v0  ;;  %v544_v6 = vadd.f32 %v543_v4, %v515_v3 }
  0xd3   : > { %620 = vst [vmem:[%s1411_s21 + $0x8] sm:$0xff] %v600_v5 }
  0xd4   : > { %621 = vst [vmem:[%s1411_s21 + $0x10] sm:$0xff] %v544_v6 }
  0xd6   : > { %v572_v7 = vpop.f32.mrf.mxu2  ;;  %v517_v10 = vpop.f32.mrf.mxu0 }
  0xd7   : > { %v573_v8 = vadd.f32 %v572_v7, %v1409_v62  ;;  %v601_v9 = vpop.f32.mrf.mxu3  ;;  %v518_v11 = vadd.f32 %v517_v10, %v1405_v57  ;;  %v546_v12 = vpop.f32.mrf.mxu1 }
  0xd9   : > { %v602_v13 = vadd.f32 %v601_v9, %v573_v8  ;;  %v547_v14 = vadd.f32 %v546_v12, %v518_v11 }
  0xdb   : > { %622 = vst [vmem:[%s1411_s21 + $0x18] sm:$0xff] %v602_v13 }
  0xdc   : > { %623 = vst [vmem:[%s1411_s21 + $0x20] sm:$0xff] %v547_v14 }
  0xde   : > { %v575_v15 = vpop.f32.mrf.mxu2  ;;  %v519_v18 = vpop.f32.mrf.mxu0 }
  0xdf   : > { %v576_v16 = vadd.f32 %v575_v15, %v1409_v62  ;;  %v604_v17 = vpop.f32.mrf.mxu3  ;;  %v520_v19 = vadd.f32 %v519_v18, %v1405_v57  ;;  %v548_v20 = vpop.f32.mrf.mxu1 }
  0xe1   : > { %v605_v21 = vadd.f32 %v604_v17, %v576_v16  ;;  %v549_v22 = vadd.f32 %v548_v20, %v520_v19 }
  0xe3   : > { %624 = vst [vmem:[%s1411_s21 + $0x28] sm:$0xff] %v605_v21 }
  0xe4   : > { %625 = vst [vmem:[%s1411_s21 + $0x30] sm:$0xff] %v549_v22 }
  0xe6   : > { %v577_v23 = vpop.f32.mrf.mxu2  ;;  %v522_v26 = vpop.f32.mrf.mxu0 }
  0xe7   : > { %v578_v24 = vadd.f32 %v577_v23, %v1409_v62  ;;  %v606_v25 = vpop.f32.mrf.mxu3  ;;  %v523_v27 = vadd.f32 %v522_v26, %v1405_v57  ;;  %v551_v28 = vpop.f32.mrf.mxu1 }
  0xe9   : > { %v607_v29 = vadd.f32 %v606_v25, %v578_v24  ;;  %v552_v30 = vadd.f32 %v551_v28, %v523_v27 }
  0xeb   : > { %626 = vst [vmem:[%s1411_s21 + $0x38] sm:$0xff] %v607_v29 }
  0xec   : > { %627 = vst [vmem:[%s1411_s21 + $0x40] sm:$0xff] %v552_v30 }
  0xee   : > { %v580_v31 = vpop.f32.mrf.mxu2  ;;  %v524_v34 = vpop.f32.mrf.mxu0 }
  0xef   : > { %v581_v32 = vadd.f32 %v580_v31, %v1409_v62  ;;  %v609_v33 = vpop.f32.mrf.mxu3  ;;  %v525_v35 = vadd.f32 %v524_v34, %v1405_v57  ;;  %v553_v36 = vpop.f32.mrf.mxu1 }
  0xf1   : > { %v610_v37 = vadd.f32 %v609_v33, %v581_v32  ;;  %v554_v38 = vadd.f32 %v553_v36, %v525_v35 }
  0xf3   : > { %628 = vst [vmem:[%s1411_s21 + $0x48] sm:$0xff] %v610_v37 }
  0xf4   : > { %629 = vst [vmem:[%s1411_s21 + $0x50] sm:$0xff] %v554_v38 }
  0xf6   : > { %v582_v39 = vpop.f32.mrf.mxu2  ;;  %v527_v42 = vpop.f32.mrf.mxu0 }
  0xf7   : > { %v583_v40 = vadd.f32 %v582_v39, %v1409_v62  ;;  %v611_v41 = vpop.f32.mrf.mxu3  ;;  %v528_v43 = vadd.f32 %v527_v42, %v1405_v57  ;;  %v556_v44 = vpop.f32.mrf.mxu1 }
  0xf9   : > { %v612_v45 = vadd.f32 %v611_v41, %v583_v40  ;;  %v557_v46 = vadd.f32 %v556_v44, %v528_v43 }
  0xfb   : > { %630 = vst [vmem:[%s1411_s21 + $0x58] sm:$0xff] %v612_v45 }
  0xfc   : > { %631 = vst [vmem:[%s1411_s21 + $0x60] sm:$0xff] %v557_v46 }
  0xfe   : > { %v585_v47 = vpop.f32.mrf.mxu2  ;;  %v529_v50 = vpop.f32.mrf.mxu0 }
  0xff   : > { %v586_v48 = vadd.f32 %v585_v47, %v1409_v62  ;;  %v614_v49 = vpop.f32.mrf.mxu3  ;;  %v530_v51 = vadd.f32 %v529_v50, %v1405_v57  ;;  %v558_v53 = vpop.f32.mrf.mxu1 }
 0x101   : > { %v615_v52 = vadd.f32 %v614_v49, %v586_v48  ;;  %v559_v54 = vadd.f32 %v558_v53, %v530_v51 }
 0x103   : > { %632 = vst [vmem:[%s1411_s21 + $0x68] sm:$0xff] %v615_v52 }
 0x104   : > { %633 = vst [vmem:[%s1411_s21 + $0x70] sm:$0xff] %v559_v54 }
 0x106   : > { %v587_v55 = vpop.f32.mrf.mxu2 }
 0x107   : > { %v588_v56 = vadd.f32 %v587_v55, %v1409_v62  ;;  %v616_v58 = vpop.f32.mrf.mxu3 }
 0x109   : > { %v617_v57 = vadd.f32 %v616_v58, %v588_v56 }
 0x10b   : > { %634 = vst [vmem:[%s1411_s21 + $0x78] sm:$0xff] %v617_v57 }
 0x10c   : > { %1190 = shalt.err (!%p1187_p0)
}
 0x10d   : > { %s1255_s10 = smov 256   ;;  %s1256_s18 = smov 16  }
 0x10e   : > { %996 = dma.vmem_to_hbm [thread:$0]  (%p1352_p2), %s652_s27, 2048, %s654_s28, %s636_s15, %s1255_s10, %s1255_s10, %s1256_s18  }
 0x10f PF: > { %s668_s20 = sand.u32 1, %s1229_s12   ;;  %p1010_p4 = pnand %p766_p10, %p1322_p5 }
 0x110   : > { %s669_s21 = scalar_lea.sflag [#allocation4], %s668_s20 }
 0x111   : > { %p1011_p6 = pneg %p1010_p4 }
 0x113   : > { %1224 = dma.done.wait (%p1011_p6), %s669_s21, 2048  }
 0x114   : > { %1226 = vsyncadd (%p1011_p6), %s669_s21, 4294965248  ;;  %s20_s17 = sadd.s32 1, %s1249_s17   ;;  %s1492_s12 = smov %s1233_s13 }
 0x115   : > { %p17_p8 = scmp.ge.s32.totalorder %s20_s17, 4   ;;  %s1493_s13 = smov %s1237_s14 }
 0x116   : > { %s1494_s14 = smov %s1362_s25  ;;  %s1495_s15 = smov %s1245_s16 }
 0x117   : > { %s1496_s16 = smov %s1498_s9  ;;  %19 = sbr.rel (!%p17_p8) target bundleno = 7 (0x7), region = 87 }
 0x11c   :  { %675 = vsyncpa [#allocation3], 1 }
 0x11d   :  { %677 = vsyncpa [#allocation3 + $0x1], 1 }
 0x11e   :  { %678 = vsyncpa [#allocation6], 1 }
 0x11f   :  { %679 = vsyncpa [#allocation4], 1 }
 0x120   :  { %681 = vsyncpa [#allocation4 + $0x1], 1 }

</bundles_post_ra>
